<compile_context>
chip_gen: v6e
topology: v6e:2x2x1
jax: 0.10.0
libtpu: 0.0.40
codegen_flags: <defaults>
</compile_context>

<pallas_src>
import jax
import jax.numpy as jnp
from jax.experimental import pallas as pl
from jax.experimental.pallas import tpu as pltpu


def _replication_mlp_kernel(xT_ref, w1_ref, b1_ref, w2_ref, b2_ref, o_ref):
    # xT_ref: (input_dim, TILE_N)   -- batch on lanes
    # w1_ref: (hidden, input_dim)   -- torch layout, VMEM-resident
    # b1_ref: (hidden, 1)           -- column, broadcasts over lanes
    # w2_ref: (hidden, 1)           -- column, broadcasts over lanes
    # b2_ref: (1, 1) in SMEM        -- scalar
    # o_ref : (1, TILE_N)           -- lane-dense output slab

    # Hidden layer: MXU matmul (f32 accumulate) + bias + ReLU on the VPU.
    h = jnp.dot(w1_ref[...], xT_ref[...], preferred_element_type=jnp.float32)
    h = jnp.maximum(h + b1_ref[...], 0.0)                       # (hidden, TILE_N)

    # Output layer: width-1 matmul replaced by VPU mul + sublane reduction.
    y = jnp.sum(h * w2_ref[...], axis=0, keepdims=True)          # (1, TILE_N)
    y = y + b2_ref[0, 0]

    o_ref[...] = jax.nn.sigmoid(y).astype(o_ref.dtype)


def replication_forward(x, w1, b1, w2, b2, *, tile_n=512):
    """x: (N, input_dim) f32, torch-layout params -> (N, 1) f32.

    w1: (hidden, input_dim), b1: (hidden,), w2: (1, hidden), b2: (1,)
    """
    assert tile_n % 128 == 0, "tile_n must be a multiple of the 128-lane width"
    n, input_dim = x.shape
    hidden = w1.shape[0]

    # Pad N up to a multiple of tile_n and put the batch on the lane (last) axis.
    num_tiles = pl.cdiv(n, tile_n)
    n_pad = num_tiles * tile_n
    xT = jnp.pad(x.T, ((0, 0), (0, n_pad - n)))                  # (input_dim, n_pad)

    b1_col = b1.reshape(hidden, 1)
    w2_col = w2.reshape(hidden, 1)
    b2_s = b2.reshape(1, 1)

    out = pl.pallas_call(
        _replication_mlp_kernel,
        out_shape=jax.ShapeDtypeStruct((1, n_pad), jnp.float32),
        grid=(num_tiles,),
        in_specs=[
            # x tile: new block per grid step (pipelined HBM->VMEM DMA).
            pl.BlockSpec((input_dim, tile_n), lambda i: (0, i)),
            # Weights / biases: constant block index -> stay VMEM-resident.
            pl.BlockSpec((hidden, input_dim), lambda i: (0, 0)),
            pl.BlockSpec((hidden, 1), lambda i: (0, 0)),
            pl.BlockSpec((hidden, 1), lambda i: (0, 0)),
            # Scalar bias lives in SMEM (no padded (8,128) VMEM tile for it).
            pl.BlockSpec(memory_space=pltpu.MemorySpace.SMEM),
        ],
        out_specs=pl.BlockSpec((1, tile_n), lambda i: (0, i)),
        compiler_params=pltpu.CompilerParams(
            # N-tiles are independent: shard across TensorCores on v7x.
            dimension_semantics=("parallel",),
        ),
    )(xT, w1, b1_col, w2_col, b2_s)

    # Back to the PyTorch module's (N, 1) output shape.
    return out[0, :n].reshape(n, 1)


def init_params(key, input_dim, hidden_dim):
    """Deterministic init mimicking torch.nn.Linear default (U[-1/sqrt(fan_in), +]).

    Weights are kept in torch layout: w1 (hidden, input_dim), w2 (1, hidden).
    """
    k1, k2, k3, k4 = jax.random.split(key, 4)
    bound1 = 1.0 / (input_dim ** 0.5)
    bound2 = 1.0 / (hidden_dim ** 0.5)
    w1 = jax.random.uniform(k1, (hidden_dim, input_dim), jnp.float32, -bound1, bound1)
    b1 = jax.random.uniform(k2, (hidden_dim,), jnp.float32, -bound1, bound1)
    w2 = jax.random.uniform(k3, (1, hidden_dim), jnp.float32, -bound2, bound2)
    b2 = jax.random.uniform(k4, (1,), jnp.float32, -bound2, bound2)
    return w1, b1, w2, b2


if __name__ == "__main__":
    input_dim, hidden_dim, batch = 16, 32, 2048   # 4 grid steps at tile_n=512

    key = jax.random.PRNGKey(0)
    kx, kp = jax.random.split(key)
    x = jax.random.normal(kx, (batch, input_dim), jnp.float32)
    w1, b1, w2, b2 = init_params(kp, input_dim, hidden_dim)

    out = replication_forward(x, w1, b1, w2, b2, tile_n=512)
    jax.block_until_ready(out)

    # Cross-check against a pure-JAX reference of the same forward pass.
    ref = jax.nn.sigmoid(jnp.maximum(x @ w1.T + b1, 0.0) @ w2.T + b2)
    assert out.shape == (batch, 1)
    assert jnp.allclose(out, ref, atol=1e-5, rtol=1e-5)

    print("KERNEL_OK")
</pallas_src>

<mosaic_0001>
module attributes {stable_mosaic.version = 11 : i64} {
  func.func @_replication_mlp_kernel(%arg0: i32, %arg1: memref<16x512xf32, #tpu.memory_space<vmem>>, %arg2: memref<32x16xf32, #tpu.memory_space<vmem>>, %arg3: memref<32x1xf32, #tpu.memory_space<vmem>>, %arg4: memref<32x1xf32, #tpu.memory_space<vmem>>, %arg5: memref<1x1xf32, #tpu.memory_space<smem>>, %arg6: memref<1x512xf32, #tpu.memory_space<vmem>>) attributes {dimension_semantics = [#tpu.dimension_semantics<parallel>], iteration_bounds = array<i64: 4>, scalar_prefetch = 0 : i64, scratch_operands = 0 : i64, tpu.core_type = #tpu.core_type<tc>, window_params = [{transform_indices = @transform_0, window_bounds = array<i64: 16, 512>}, {pipeline_mode = #tpu.pipeline_mode<synchronous>, transform_indices = @transform_1, window_bounds = array<i64: 32, 16>}, {pipeline_mode = #tpu.pipeline_mode<synchronous>, transform_indices = @transform_2, window_bounds = array<i64: 32, 1>}, {pipeline_mode = #tpu.pipeline_mode<synchronous>, transform_indices = @transform_3, window_bounds = array<i64: 32, 1>}, {transform_indices = @transform_4, window_bounds = array<i64: 1, 1>}, {transform_indices = @transform_5, window_bounds = array<i64: 1, 512>}]} {
    %c0 = arith.constant 0 : index
    %c0_0 = arith.constant 0 : index
    %0 = vector.load %arg2[%c0, %c0_0] : memref<32x16xf32, #tpu.memory_space<vmem>>, vector<32x16xf32>
    %c0_1 = arith.constant 0 : index
    %c0_2 = arith.constant 0 : index
    %1 = vector.load %arg1[%c0_1, %c0_2] : memref<16x512xf32, #tpu.memory_space<vmem>>, vector<16x512xf32>
    %cst = arith.constant dense<0.000000e+00> : vector<32x512xf32>
    %2 = tpu.matmul %0, %1, %cst {dimension_numbers = #tpu.dot_dimension_numbers<[1], [0], [0], [1], [0, 0, 1, 1], [], []>} : vector<32x16xf32>, vector<16x512xf32>, vector<32x512xf32> -> vector<32x512xf32>
    %c0_3 = arith.constant 0 : index
    %c0_4 = arith.constant 0 : index
    %3 = vector.load %arg3[%c0_3, %c0_4] : memref<32x1xf32, #tpu.memory_space<vmem>>, vector<32x1xf32>
    %4 = vector.broadcast %3 : vector<32x1xf32> to vector<32x512xf32>
    %5 = arith.addf %2, %4 : vector<32x512xf32>
    %cst_5 = arith.constant 0.000000e+00 : f32
    %6 = vector.broadcast %cst_5 : f32 to vector<32x512xf32>
    %7 = arith.maximumf %5, %6 : vector<32x512xf32>
    %c0_6 = arith.constant 0 : index
    %c0_7 = arith.constant 0 : index
    %8 = vector.load %arg4[%c0_6, %c0_7] : memref<32x1xf32, #tpu.memory_space<vmem>>, vector<32x1xf32>
    %9 = vector.broadcast %8 : vector<32x1xf32> to vector<32x512xf32>
    %10 = arith.mulf %7, %9 : vector<32x512xf32>
    %cst_8 = arith.constant dense<0.000000e+00> : vector<512xf32>
    %11 = vector.multi_reduction <add>, %10, %cst_8 [0] : vector<32x512xf32> to vector<512xf32>
    %12 = vector.shape_cast %11 : vector<512xf32> to vector<1x512xf32>
    %c0_9 = arith.constant 0 : index
    %c0_10 = arith.constant 0 : index
    %13 = memref.load %arg5[%c0_9, %c0_10] : memref<1x1xf32, #tpu.memory_space<smem>>
    %14 = vector.broadcast %13 : f32 to vector<1x512xf32>
    %15 = arith.addf %12, %14 : vector<1x512xf32>
    %16 = arith.negf %15 : vector<1x512xf32>
    %17 = math.exp %16 : vector<1x512xf32>
    %cst_11 = arith.constant 1.000000e+00 : f32
    %18 = vector.broadcast %cst_11 : f32 to vector<1x512xf32>
    %19 = arith.addf %18, %17 : vector<1x512xf32>
    %20 = arith.divf %18, %19 : vector<1x512xf32>
    %c0_12 = arith.constant 0 : index
    %c0_13 = arith.constant 0 : index
    %21 = vector.load %arg6[%c0_12, %c0_13] : memref<1x512xf32, #tpu.memory_space<vmem>>, vector<1x512xf32>
    tpu.vector_store %arg6[%c0_12, %c0_13], %20 {strides = array<i32>} : memref<1x512xf32, #tpu.memory_space<vmem>>, vector<1x512xf32>,
    return
  }
  func.func @transform_0(%arg0: i32) -> (i32, i32) {
    %c0_i32 = arith.constant 0 : i32
    %c0_i32_0 = arith.constant 0 : i32
    return %c0_i32, %arg0 : i32, i32
  }
  func.func @transform_1(%arg0: i32) -> (i32, i32) {
    %c0_i32 = arith.constant 0 : i32
    %c0_i32_0 = arith.constant 0 : i32
    %c0_i32_1 = arith.constant 0 : i32
    return %c0_i32, %c0_i32_0 : i32, i32
  }
  func.func @transform_2(%arg0: i32) -> (i32, i32) {
    %c0_i32 = arith.constant 0 : i32
    %c0_i32_0 = arith.constant 0 : i32
    %c0_i32_1 = arith.constant 0 : i32
    return %c0_i32, %c0_i32_0 : i32, i32
  }
  func.func @transform_3(%arg0: i32) -> (i32, i32) {
    %c0_i32 = arith.constant 0 : i32
    %c0_i32_0 = arith.constant 0 : i32
    %c0_i32_1 = arith.constant 0 : i32
    return %c0_i32, %c0_i32_0 : i32, i32
  }
  func.func @transform_4(%arg0: i32) -> (i32, i32) {
    %c0_i32 = arith.constant 0 : i32
    %c0_i32_0 = arith.constant 0 : i32
    %c0_i32_1 = arith.constant 0 : i32
    return %c0_i32, %c0_i32_0 : i32, i32
  }
  func.func @transform_5(%arg0: i32) -> (i32, i32) {
    %c0_i32 = arith.constant 0 : i32
    %c0_i32_0 = arith.constant 0 : i32
    return %c0_i32, %arg0 : i32, i32
  }
}

</mosaic_0001>

<bundles_post_ra>
// kernel: tpu_custom_call.1
= control target key start
LH: loop header
LB: loop body
LE: loop exit
PB: predicated region body
PF: predicated region fallthrough
CT: control target
= control target key end

     0   :  { %s1132_s0 = inlined_call_operand.hbm [shape: f32[16,2048], index: 0, kind: input, shape index: {}]   ;;  %s1133_s1 = inlined_call_operand.vmem [shape: f32[32,16], index: 1, kind: input, shape index: {}]   ;;  %s1134_s2 = inlined_call_operand.vmem [shape: f32[32,1], index: 2, kind: input, shape index: {}]   ;;  %s1135_s3 = inlined_call_operand.vmem [shape: f32[32,1], index: 3, kind: input, shape index: {}]   ;;  %s1136_s4 = inlined_call_operand.<no memory space> [shape: f32[1,1], index: 4, kind: input, shape index: {}]   ;;  %s1137_s5 = inlined_call_operand.hbm [shape: f32[1,2048], index: 5, kind: output, shape index: {}]  }
   0x1   :  { %10 = sst [smem:[#allocation2]] %s1136_s4 }
   0x2   :  { %11 = vsyncpa [#allocation4], 0 }
   0x3   :  { %13 = vsyncpa [#allocation4 + $0x1], 0 }
   0x4   :  { %14 = vsyncpa [#allocation5], 0 }
   0x5   :  { %16 = vsyncpa [#allocation5 + $0x1], 0  ;;  %s947_s20 = smov 0   ;;  %s949_s21 = smov 0  }
   0x6   :  { %s951_s22 = smov 0   ;;  %s953_s23 = smov 0  }
   0x7 LB: > { %s968_s4 = sadd.s32 4294967295, %s904_s23   ;;  %s714_s24 = sadd.s32 4294967294, %s904_s23   ;;  %s904_s23 = sphi %s953_s23, %s1152_s23   ;;  %s900_s22 = sphi %s951_s22, %s1151_s22   ;;  %s896_s21 = sphi %s949_s21, %s1150_s21   ;;  %s892_s20 = sphi %s947_s20, %s1149_s20  }
   0x8   : > { %s972_s25 = sadd.s32 1, %s904_s23   ;;  %s29_s26 = sadd.s32 1, %s900_s22 }
   0x9   : > { %s26_s27 = ssub.s32 %s904_s23, %s972_s25  ;;  %p36_p0 = scmp.ne.s32.totalorder %s900_s22, %s896_s21 }
   0xa   : > { %p27_p1 = scmp.eq.s32.totalorder %s26_s27, 0  ;;  %p37_p2 = scmp.eq.s32.totalorder %s904_s23, 0 }
   0xb   : > { %p42_p3 = scmp.ne.s32.totalorder %s896_s21, %s892_s20  ;;  %p43_p4 = scmp.eq.s32.totalorder %s968_s4, 0 }
   0xc   : > { %s984_s28 = scalar_select %p27_p1, %s900_s22, %s29_s26  }
   0xd   : > { %p986_p5 = por %p37_p2, %p36_p0  ;;  %p990_p6 = por %p43_p4, %p42_p3 }
   0xe   : > { %p150_p7 = scmp.eq.s32.totalorder %s968_s4, 3  ;;  %p156_p8 = scmp.eq.s32.totalorder %s714_s24, 3 }
   0xf   : > { %s1141_s30 = scalar_select %p990_p6, 1, 0 }
  0x10   : > { %p754_p9 = scmp.lt.s32.totalorder %s904_s23, 4  ;;  %p996_p10 = por %p150_p7, %p36_p0 }
  0x11   : > { %p1000_p11 = por %p156_p8, %p42_p3  ;;  %s188_s8 = sand.u32 1, %s900_s22  }
  0x12   : > { %s1142_s6 = scalar_select %p996_p10, 1, 0 }
  0x13   : > { %s1143_s7 = scalar_select %p1000_p11, 1, 0 }
  0x14   : > { %s740_s9 = sshll.u32 %s904_s23, 9  ;;  %s717_s10 = sshll.u32 %s188_s8, 6 }
  0x15   : > { %s1009_s13 = scalar_lea.hbm %s1132_s0, %s740_s9  ;;  %s192_s14 = scalar_lea.vmem [#allocation3], %s717_s10 }
  0x16   : > { %s199_s15 = sshll.u32 %s192_s14, 4  ;;  %p1013_p12 = pnand %p754_p9, %p986_p5  ;;  %s1017_s15 = int_to_ptr.vmem [resolvable:$true] %s199_s15 }
  0x17   : > { %s1020_s17 = scalar_lea.sflag [#allocation4], %s188_s8  ;;  %s812_s18 = scalar_lea.hbm %s1009_s13, 1024 }
  0x18   : > { %p813_p0 = scmp.ne.s32.totalorder %s1009_s13, %s812_s18  ;;  %p814_p1 = pneg %p1013_p12 }
  0x19   : > { %s817_s26 = scalar_lea.hbm %s1132_s0, 4096  ;;  %p818_p4 = scmp.lt.s32.totalorder %s1009_s13, %s1132_s0 }
  0x1a   : > { %p815_p2 = pnand %p814_p1, %p813_p0  ;;  %p819_p5 = scmp.lt.s32.totalorder %s817_s26, %s812_s18 }
  0x1c   : > { %p816_p3 = pneg %p815_p2  ;;  %p820_p7 = por %p819_p5, %p818_p4 }
  0x1e   : > { %p821_p8 = pnand %p820_p7, %p816_p3 }
  0x20   : > { %824 = shalt.err (!%p821_p8)
}
  0x21   : > { %s825_s8 = scalar_lea.vmem %s1017_s15, 1024  ;;  %s906_s9 = smov [#allocation3]  }
  0x22   : > { %p826_p9 = scmp.ne.s32.totalorder %s1017_s15, %s825_s8  ;;  %s830_s10 = sshll.u32 %s906_s9, 4  ;;  %s831_s10 = int_to_ptr.vmem [resolvable:$false] %s830_s10 }
  0x23   : > { %s832_s11 = scalar_lea.vmem %s831_s10, 2048  ;;  %p833_p2 = scmp.lt.s32.totalorder %s1017_s15, %s831_s10 }
  0x24   : > { %p828_p13 = pnand %p826_p9, %p814_p1  ;;  %p834_p11 = scmp.lt.s32.totalorder %s832_s11, %s825_s8 }
  0x26   : > { %p829_p0 = pneg %p828_p13  ;;  %p835_p10 = por %p834_p11, %p833_p2 }
  0x28   : > { %p836_p6 = pnand %p835_p10, %p829_p0 }
  0x2a   : > { %839 = shalt.err (!%p836_p6)
}
  0x2b   : > { %s907_s12 = smov 2048   ;;  %s908_s14 = smov 512  }
  0x2c   : > { %s909_s18 = smov 32   ;;  %p207_p13 = scmp.lt.s32.totalorder %s904_s23, 5 }
  0x2d   : > { %749 = dma.hbm_to_vmem [thread:$0]  (!%p1013_p12), %s1009_s13, 1024, %s1017_s15, %s1020_s17, %s907_s12, %s908_s14, %s909_s18  }
  0x2e   : > { %p1145_p1 = scmp.ge.s32.totalorder %s904_s23, 1 }
  0x30   : > { %p208_p3 = pnand %p1145_p1, %p207_p13 }
  0x31   : > { %s1045_s19 = sand.u32 (!%p208_p3), 1, %s896_s21   ;;  %p1146_p6 = scmp.ne.s32.totalorder (!%p208_p3), %s1141_s30, 0 }
  0x32   : > { %211 = sbr.rel (%p208_p3) target bundleno = 347 (0x15b), region = 40  ;;  %s721_s24 = sshll.u32 (!%p208_p3), %s1045_s19, 6 }
  0x33   : > { %s214_s26 = scalar_lea.sflag (!%p208_p3), [#allocation4], %s1045_s19  ;;  %s217_s27 = scalar_lea.vmem (!%p208_p3), [#allocation3], %s721_s24 }
  0x37   : > { %883 = dma.done.wait (%p1146_p6), %s214_s26, 1024  }
  0x38   : > { %885 = vsyncadd (%p1146_p6), %s214_s26, 4294966272  ;;  %v910_v0 = vmov 0.0   ;;  %v911_v1 = vmov 0   ;;  %v255_v2 = vld [vmem:[%s217_s27 + $0x28] sm:$0xff]  ;;  %v257_v3 = vld [vmem:[%s217_s27 + $0x38] sm:$0xff]  ;;  %vm282_vm0 = vcmask 130048  }
  0x39   : > { %359 = vmatprep.mubr.f32.mxu0 %v910_v0  ;;  %448 = vmatprep.mubr.f32.mxu1 %v910_v0  ;;  %v254_v4 = vld [vmem:[%s217_s27 + $0x20] sm:$0xff]  ;;  %v256_v5 = vld [vmem:[%s217_s27 + $0x30] sm:$0xff]  ;;  %v251_v6 = vld [vmem:[%s217_s27 + $0x8] sm:$0xff]  ;;  %s565_s10 = sld [smem:[#allocation2]]  ;;  %s722_s11 = sshll.u32 %s1045_s19, 2 }
  0x3a   : > { %794 = vset.pattern.permute.xlu0 %v911_v1  ;;  %795 = vset.pattern.permute.xlu1 %v911_v1  ;;  %v253_v7 = vld [vmem:[%s217_s27 + $0x18] sm:$0xff]  ;;  %v250_v8 = vld [vmem:[%s217_s27] sm:$0xff]  ;;  %v252_v9 = vld [vmem:[%s217_s27 + $0x10] sm:$0xff]  ;;  %s741_s12 = sshll.u32 %s968_s4, 6  ;;  %s243_s14 = scalar_lea.vmem [#allocation6], %s722_s11 }
  0x3b   : > { %323 = vmatprep.subr.mxu0 %v255_v2  ;;  %412 = vmatprep.subr.mxu1 %v257_v3  ;;  %v246_v10 = vld [vmem:[%s1133_s1] sm:$0xff]  ;;  %v260_v12 = vld [vmem:[%s1134_s2 + $0x10] sm:$0xff]  ;;  %v247_v13 = vld [vmem:[%s1133_s1 + $0x8] sm:$0xff]  ;;  %s644_s18 = sshll.u32 %s243_s14, 4  ;;  %s642_s27 = scalar_lea.hbm %s1137_s5, %s741_s12  ;;  %s645_s18 = int_to_ptr.vmem [resolvable:$true] %s644_s18 }
  0x3c   : > { %324 = vmatpush1.msra.mxu0 %v254_v4  ;;  %413 = vmatpush1.msra.mxu1 %v256_v5  ;;  %v258_v11 = vld [vmem:[%s1134_s2] sm:$0xff]  ;;  %v259_v14 = vld [vmem:[%s1134_s2 + $0x8] sm:$0xff]  ;;  %v261_v15 = vld [vmem:[%s1134_s2 + $0x18] sm:$0xff]  ;;  %s630_s30 = scalar_lea.sflag [#allocation5], %s1045_s19  ;;  %s840_s13 = scalar_lea.vmem %s645_s18, 64 }
  0x3d   : > { %325 = vmatprep.subr.mxu0 %v251_v6  ;;  %414 = vmatprep.subr.mxu1 %v253_v7  ;;  %v248_v16 = vld [vmem:[%s1133_s1 + $0x10] sm:$0xff]  ;;  %v489_v17 = vld [vmem:[%s1135_s3] sm:$0xff]  ;;  %v490_v18 = vld [vmem:[%s1135_s3 + $0x8] sm:$0xff]  ;;  %p841_p10 = scmp.ne.s32.totalorder %s645_s18, %s840_s13  ;;  %p1147_p11 = scmp.ne.s32.totalorder %s1142_s6, 0 }
  0x3e   : > { %326 = vmatpush1.msra.mxu0 %v250_v8  ;;  %415 = vmatpush1.msra.mxu1 %v252_v9  ;;  %v249_v19 = vld [vmem:[%s1133_s1 + $0x18] sm:$0xff]  ;;  %v491_v20 = vld [vmem:[%s1135_s3 + $0x10] sm:$0xff]  ;;  %s913_s15 = smov [#allocation6]  }
  0x3f   : > { %723 = vmatmul.mubr.msk.f32.vlgmr.msra.gmra.mxu0 %vm282_vm0, %v246_v10  ;;  %727 = vmatmul.mubr.msk.f32.vlgmr.msra.gmra.mxu1 %vm282_vm0, %v246_v10  ;;  %v492_v21 = vld [vmem:[%s1135_s3 + $0x18] sm:$0xff]  ;;  %p842_p12 = pnand %p841_p10, %p1147_p11  ;;  %s844_s16 = sshll.u32 %s913_s15, 4  ;;  %s845_s16 = int_to_ptr.vmem [resolvable:$false] %s844_s16 }
  0x40   : > { %365 = vmatprep.mubr.f32.mxu0 %v910_v0  ;;  %454 = vmatprep.mubr.f32.mxu1 %v910_v0  ;;  %s846_s4 = scalar_lea.vmem %s845_s16, 128  ;;  %p847_p5 = scmp.lt.s32.totalorder %s645_s18, %s845_s16 }
  0x41   : > { %264 = vperm.xlu0 %794, %v258_v11   ;;  %274 = vperm.xlu1 %795, %v260_v12   ;;  %p843_p4 = pneg %p842_p12  ;;  %p848_p7 = scmp.lt.s32.totalorder %s846_s4, %s840_s13 }
  0x43   : > { %724 = vmatmul.mubr.msk.f32.gmra.mxu0 %vm282_vm0, %v247_v13  ;;  %728 = vmatmul.mubr.msk.f32.gmra.mxu1 %vm282_vm0, %v247_v13  ;;  %p849_p8 = por %p848_p7, %p847_p5 }
  0x44   : > { %371 = vmatprep.mubr.f32.mxu0 %v910_v0  ;;  %460 = vmatprep.mubr.f32.mxu1 %v910_v0 }
  0x45   : > { %269 = vperm.xlu0 %794, %v259_v14   ;;  %279 = vperm.xlu1 %795, %v261_v15   ;;  %p850_p9 = pnand %p849_p8, %p843_p4 }
  0x47   : > { %725 = vmatmul.mubr.msk.f32.gmra.mxu0 %vm282_vm0, %v248_v16  ;;  %729 = vmatmul.mubr.msk.f32.gmra.mxu1 %vm282_vm0, %v248_v16 }
  0x48   : > { %377 = vmatprep.mubr.f32.mxu0 %v910_v0  ;;  %466 = vmatprep.mubr.f32.mxu1 %v910_v0 }
  0x49   : > { %495 = vperm.xlu0 %794, %v489_v17   ;;  %500 = vperm.xlu1 %795, %v490_v18  }
  0x4b   : > { %726 = vmatmul.mubr.msk.f32.gmra.mxu0 %vm282_vm0, %v249_v19  ;;  %730 = vmatmul.mubr.msk.f32.gmra.mxu1 %vm282_vm0, %v249_v19 }
  0x4d   : > { %505 = vperm.xlu0 %794, %v491_v20   ;;  %510 = vperm.xlu1 %795, %v492_v21  }
  0xbc   : > { %v265_v22 = vpop.permute.xlu0 %264  ;;  %v275_v23 = vpop.permute.xlu1 %274 }
  0xc0   : > { %v270_v24 = vpop.permute.xlu0 %269  ;;  %v280_v31 = vpop.permute.xlu1 %279 }
  0xc4   : > { %v496_v36 = vpop.permute.xlu0 %495  ;;  %v501_v51 = vpop.permute.xlu1 %500 }
  0xc8   : > { %v506_v60 = vpop.permute.xlu0 %505 }
  0xff   : > { %v361_v25 = vpop.f32.mrf.mxu0  ;;  %v450_v26 = vpop.f32.mrf.mxu1 }
 0x100   : > { %v362_v27 = vadd.f32 %v361_v25, %v265_v22  ;;  %v451_v28 = vadd.f32 %v450_v26, %v265_v22  ;;  %v511_v25 = vpop.permute.xlu1 %510 }
 0x101   : > { %v363_v29 = vpop.f32.mrf.mxu0  ;;  %v452_v30 = vpop.f32.mrf.mxu1 }
 0x102   : > { %v364_v32 = vadd.f32 %v363_v29, %v265_v22  ;;  %v453_v33 = vadd.f32 %v452_v30, %v265_v22  ;;  %v473_v37 = vmax.f32 %v362_v27, 0.0  ;;  %v475_v38 = vmax.f32 %v451_v28, 0.0 }
 0x103   : > { %v367_v34 = vpop.f32.mrf.mxu0  ;;  %v456_v35 = vpop.f32.mrf.mxu1 }
 0x104   : > { %v368_v39 = vadd.f32 %v367_v34, %v270_v24  ;;  %v457_v40 = vadd.f32 %v456_v35, %v270_v24  ;;  %v474_v45 = vmax.f32 %v364_v32, 0.0  ;;  %v476_v46 = vmax.f32 %v453_v33, 0.0 }
 0x105   : > { %v369_v41 = vpop.f32.mrf.mxu0  ;;  %v458_v42 = vpop.f32.mrf.mxu1  ;;  %v513_v56 = vmul.f32 %v496_v36, %v473_v37  ;;  %v515_v57 = vmul.f32 %v496_v36, %v475_v38 }
 0x106   : > { %v370_v43 = vadd.f32 %v369_v41, %v270_v24  ;;  %v459_v44 = vadd.f32 %v458_v42, %v270_v24  ;;  %v477_v47 = vmax.f32 %v368_v39, 0.0  ;;  %v479_v48 = vmax.f32 %v457_v40, 0.0 }
 0x107   : > { %v373_v49 = vpop.f32.mrf.mxu0  ;;  %v462_v50 = vpop.f32.mrf.mxu1  ;;  %v514_v1 = vmul.f32 %v496_v36, %v474_v45  ;;  %v516_v2 = vmul.f32 %v496_v36, %v476_v46 }
 0x108   : > { %v478_v52 = vmax.f32 %v370_v43, 0.0  ;;  %v480_v53 = vmax.f32 %v459_v44, 0.0  ;;  %v374_v54 = vadd.f32 %v373_v49, %v275_v23  ;;  %v463_v55 = vadd.f32 %v462_v50, %v275_v23 }
 0x109   : > { %v375_v58 = vpop.f32.mrf.mxu0  ;;  %v464_v59 = vpop.f32.mrf.mxu1  ;;  %v517_v61 = vmul.f32 %v501_v51, %v477_v47  ;;  %v519_v62 = vmul.f32 %v501_v51, %v479_v48 }
 0x10a   : > { %v481_v63 = vmax.f32 %v374_v54, 0.0  ;;  %v483_v0 = vmax.f32 %v463_v55, 0.0  ;;  %v376_v3 = vadd.f32 %v375_v58, %v275_v23  ;;  %v465_v4 = vadd.f32 %v464_v59, %v275_v23 }
 0x10b   : > { %v379_v5 = vpop.f32.mrf.mxu0  ;;  %v468_v6 = vpop.f32.mrf.mxu1  ;;  %v518_v7 = vmul.f32 %v501_v51, %v478_v52  ;;  %v520_v8 = vmul.f32 %v501_v51, %v480_v53  ;;  %v529_v17 = vadd.f32 %v517_v61, %v513_v56  ;;  %v547_v18 = vadd.f32 %v519_v62, %v515_v57 }
 0x10c   : > { %v521_v9 = vmul.f32 %v506_v60, %v481_v63  ;;  %v523_v10 = vmul.f32 %v506_v60, %v483_v0  ;;  %v482_v11 = vmax.f32 %v376_v3, 0.0  ;;  %v484_v12 = vmax.f32 %v465_v4, 0.0 }
 0x10d   : > { %v380_v13 = vadd.f32 %v379_v5, %v280_v31  ;;  %v469_v14 = vadd.f32 %v468_v6, %v280_v31  ;;  %v381_v15 = vpop.f32.mrf.mxu0  ;;  %v470_v16 = vpop.f32.mrf.mxu1  ;;  %v538_v26 = vadd.f32 %v518_v7, %v514_v1  ;;  %v556_v27 = vadd.f32 %v520_v8, %v516_v2 }
 0x10e   : > { %v382_v19 = vadd.f32 %v381_v15, %v280_v31  ;;  %v471_v20 = vadd.f32 %v470_v16, %v280_v31  ;;  %v522_v21 = vmul.f32 %v506_v60, %v482_v11  ;;  %v524_v22 = vmul.f32 %v506_v60, %v484_v12 }
 0x10f   : > { %v485_v24 = vmax.f32 %v380_v13, 0.0  ;;  %v487_v23 = vmax.f32 %v469_v14, 0.0  ;;  %v530_v30 = vadd.f32 %v529_v17, %v521_v9  ;;  %v548_v32 = vadd.f32 %v547_v18, %v523_v10 }
 0x110   : > { %v486_v28 = vmax.f32 %v382_v19, 0.0  ;;  %v488_v29 = vmax.f32 %v471_v20, 0.0  ;;  %v539_v35 = vadd.f32 %v538_v26, %v522_v21  ;;  %v557_v36 = vadd.f32 %v556_v27, %v524_v22 }
 0x111   : > { %v525_v33 = vmul.f32 %v511_v25, %v485_v24  ;;  %v527_v34 = vmul.f32 %v511_v25, %v487_v23  ;;  %v566_v60 = vstv %s565_s10  ;;  %v912_v19 = vmov 1966171168  }
 0x112   : > { %v526_v37 = vmul.f32 %v511_v25, %v486_v28  ;;  %v528_v38 = vmul.f32 %v511_v25, %v488_v29  ;;  %v602_v20 = vunpack.c.l.s4 %v912_v19  ;;  %v604_v21 = vlaneseq }
 0x113   : > { %v531_v39 = vadd.f32 %v530_v30, %v525_v33  ;;  %v549_v40 = vadd.f32 %v548_v32, %v527_v34 }
 0x114   : > { %v540_v31 = vadd.f32 %v539_v35, %v526_v37  ;;  %v558_v41 = vadd.f32 %v557_v36, %v528_v38  ;;  %v603_v22 = vunpack.c.0.s8 %v602_v20  ;;  %v605_v24 = vshrl.u32 %v604_v21, 7 }
 0x115   : > { %v532_v42 = vrot.slane %v531_v39, 4  ;;  %v550_v43 = vrot.slane %v549_v40, 4  ;;  %vm626_vm1 = vcmp.lt.s32.totalorder %v604_v21, 512 }
 0x116   : > { %v541_v44 = vrot.slane %v540_v31, 4  ;;  %v559_v45 = vrot.slane %v558_v41, 4  ;;  %v606_v26 = vsub.s32 %v603_v22, %v605_v24 }
 0x117   : > { %v533_v46 = vadd.f32 %v532_v42, %v531_v39  ;;  %v551_v47 = vadd.f32 %v550_v43, %v549_v40 }
 0x118   : > { %v542_v48 = vadd.f32 %v541_v44, %v540_v31  ;;  %v560_v49 = vadd.f32 %v559_v45, %v558_v41 }
 0x119   : > { %v534_v50 = vrot.slane %v533_v46, 2  ;;  %v552_v51 = vrot.slane %v551_v47, 2 }
 0x11a   : > { %v543_v52 = vrot.slane %v542_v48, 2  ;;  %v561_v53 = vrot.slane %v560_v49, 2 }
 0x11b   : > { %v535_v54 = vadd.f32 %v534_v50, %v533_v46  ;;  %v553_v55 = vadd.f32 %v552_v51, %v551_v47 }
 0x11c   : > { %v544_v56 = vadd.f32 %v543_v52, %v542_v48  ;;  %v562_v57 = vadd.f32 %v561_v53, %v560_v49 }
 0x11d   : > { %v536_v58 = vrot.slane %v535_v54, 1  ;;  %v554_v59 = vrot.slane %v553_v55, 1 }
 0x11e   : > { %v545_v61 = vrot.slane %v544_v56, 1  ;;  %v563_v62 = vrot.slane %v562_v57, 1 }
 0x11f   : > { %v537_v63 = vadd.f32 %v536_v58, %v535_v54  ;;  %v555_v0 = vadd.f32 %v554_v59, %v553_v55 }
 0x120   : > { %v546_v1 = vadd.f32 %v545_v61, %v544_v56  ;;  %v564_v2 = vadd.f32 %v563_v62, %v562_v57 }
 0x121   : > { %v567_v3 = vadd.f32 %v566_v60, %v537_v63  ;;  %v569_v4 = vadd.f32 %v566_v60, %v555_v0 }
 0x122   : > { %v568_v5 = vadd.f32 %v566_v60, %v546_v1  ;;  %v570_v6 = vadd.f32 %v566_v60, %v564_v2 }
 0x123   : > { %v731_v7 = vmul.f32 -1.442695, %v567_v3  ;;  %v733_v8 = vmul.f32 -1.442695, %v569_v4 }
 0x124   : > { %v732_v9 = vmul.f32 -1.442695, %v568_v5  ;;  %v734_v10 = vmul.f32 -1.442695, %v570_v6 }
 0x125   : > { %796 = vpow2.f32 %v731_v7 }
 0x126   : > { %798 = vpow2.f32 %v733_v8 }
 0x127   : > { %800 = vpow2.f32 %v732_v9 }
 0x128   : > { %802 = vpow2.f32 %v734_v10 }
 0x132   : > { %v797_v11 = vpop.eup %796 }
 0x133   : > { %v799_v12 = vpop.eup %798  ;;  %v583_v13 = vadd.f32 1.0, %v797_v11 }
 0x134   : > { %v801_v14 = vpop.eup %800  ;;  %v585_v15 = vadd.f32 1.0, %v799_v12 }
 0x135   : > { %v803_v16 = vpop.eup %802  ;;  %804 = vrcp.f32 %v583_v13  ;;  %v584_v17 = vadd.f32 1.0, %v801_v14 }
 0x136   : > { %806 = vrcp.f32 %v585_v15  ;;  %v586_v18 = vadd.f32 1.0, %v803_v16 }
 0x137   : > { %808 = vrcp.f32 %v584_v17 }
 0x138   : > { %810 = vrcp.f32 %v586_v18 }
 0x142   : > { %v805_v23 = vpop.eup %804 }
 0x143   : > { %v807_v25 = vpop.eup %806 }
 0x144   : > { %v809_v27 = vpop.eup %808 }
 0x145   : > { %v811_v28 = vpop.eup %810  ;;  %v599_v29 = vcombine.low %v805_v23, %v809_v27 }
 0x146   : > { %v600_v30 = vcombine.low %v807_v25, %v811_v28 }
 0x147   : > { %v607_v32 = vrot.slane %v599_v29, %v606_v26 }
 0x148   : > { %v614_v33 = vrot.slane %v600_v30, %v606_v26 }
 0x14a   : > { %v615_v34 = vcombine.low %v607_v32, %v614_v33 }
 0x14c   : > { %v622_v35 = vrot.slane %v615_v34, %v606_v26 }
 0x14e   : > { %628 = vst.msk [vmem:[%s243_s14] sm:$0xf] %vm626_vm1, %v622_v35 }
 0x14f   : > { %853 = shalt.err (!%p850_p9)
}
 0x150   : > { %s854_s17 = scalar_lea.hbm %s642_s27, 64  ;;  %s858_s8 = scalar_lea.hbm %s1137_s5, 256 }
 0x151   : > { %p855_p0 = scmp.ne.s32.totalorder %s642_s27, %s854_s17  ;;  %p859_p1 = scmp.lt.s32.totalorder %s642_s27, %s1137_s5 }
 0x152   : > { %p860_p3 = scmp.lt.s32.totalorder %s858_s8, %s854_s17 }
 0x153   : > { %p856_p2 = pnand %p855_p0, %p1147_p11 }
 0x154   : > { %p861_p6 = por %p860_p3, %p859_p1 }
 0x155   : > { %p857_p13 = pneg %p856_p2 }
 0x157   : > { %p862_p10 = pnand %p861_p6, %p857_p13 }
 0x159   : > { %865 = shalt.err (!%p862_p10)
}
 0x15a   : > { %744 = dma.vmem_to_hbm [thread:$0]  (%p1147_p11), %s645_s18, 64, %s642_s27, %s630_s30  }
 0x15b PF: > { %p755_p12 = scmp.ge.s32.totalorder %s904_s23, 2  ;;  %s656_s11 = sand.u32 1, %s892_s20  }
 0x15c   : > { %p1148_p4 = scmp.ne.s32.totalorder %s1143_s7, 0  ;;  %s657_s12 = scalar_lea.sflag [#allocation5], %s656_s11 }
 0x15e   : > { %p751_p5 = pnand %p755_p12, %p1148_p4 }
 0x160   : > { %p752_p7 = pneg %p751_p5 }
 0x162   : > { %887 = dma.done.wait (%p752_p7), %s657_s12, 64  }
 0x163   : > { %889 = vsyncadd (%p752_p7), %s657_s12, 4294967232  ;;  %p19_p8 = scmp.ge.s32.totalorder %s972_s25, 6   ;;  %s1149_s20 = smov %s896_s21 }
 0x164   : > { %s1150_s21 = smov %s900_s22  ;;  %s1151_s22 = smov %s984_s28 }
 0x165   : > { %s1152_s23 = smov %s972_s25  ;;  %21 = sbr.rel (!%p19_p8) target bundleno = 7 (0x7), region = 85 }
 0x16a   :  { %662 = vsyncpa [#allocation4], 1 }
 0x16b   :  { %664 = vsyncpa [#allocation4 + $0x1], 1 }
 0x16c   :  { %665 = vsyncpa [#allocation5], 1 }
 0x16d   :  { %667 = vsyncpa [#allocation5 + $0x1], 1 }

</bundles_post_ra>
